<compile_context>
chip_gen: v7x
topology: tpu7x:2x2x1
jax: 0.10.0
libtpu: 0.0.40
codegen_flags: <defaults>
</compile_context>

<pallas_src>
import functools
import math

import jax
import jax.numpy as jnp
from jax.experimental import pallas as pl
from jax.experimental.pallas import tpu as pltpu


def channel_attention_kernel(x_ref, w1t_ref, b1_ref, w2t_ref, b2_ref,
                             o_ref, max_acc, sum_acc, *, hw_total):
    # x_ref:   VMEM (nb, C, hw_tile)  -- lane-dense spatial chunk
    # w1t_ref: VMEM (C, Cr)  b1_ref: VMEM (1, Cr)
    # w2t_ref: VMEM (Cr, C)  b2_ref: VMEM (1, C)
    # o_ref:   VMEM (nb, C)
    # max_acc/sum_acc: VMEM (nb, C) f32 running reductions over the HW axis.
    k = pl.program_id(1)

    @pl.when(k == 0)
    def _init():
        max_acc[...] = jnp.full_like(max_acc, -jnp.inf)
        sum_acc[...] = jnp.zeros_like(sum_acc)

    x = x_ref[...]                                           # native dtype, no f32 copy
    max_acc[...] = jnp.maximum(max_acc[...],
                               jnp.max(x, axis=-1).astype(jnp.float32))
    sum_acc[...] = sum_acc[...] + jnp.sum(x, axis=-1, dtype=jnp.float32)

    @pl.when(k == pl.num_programs(1) - 1)
    def _finalize():
        mx = max_acc[...]                                    # (nb, C) f32
        av = sum_acc[...] * (1.0 / hw_total)                 # (nb, C) f32
        nb = mx.shape[0]

        # Shared MLP, both pooled vectors batched into one matmul pair.
        pooled = jnp.concatenate([mx, av], axis=0)           # (2*nb, C)
        h = jnp.dot(pooled, w1t_ref[...],
                    preferred_element_type=jnp.float32) + b1_ref[...]
        h = jnp.maximum(h, 0.0)
        z = jnp.dot(h, w2t_ref[...],
                    preferred_element_type=jnp.float32) + b2_ref[...]
        y = z[:nb] + z[nb:]                                  # mlp(mx) + mlp(av)
        o_ref[...] = (1.0 / (1.0 + jnp.exp(-y))).astype(o_ref.dtype)   # sigmoid


def _tpu_info():
    try:
        return pltpu.get_tpu_info()
    except Exception:
        return None


def _num_tensorcores(info):
    """TensorCores per chip: 1 on v5e/v6e, 2 on v7x. Conservative default 1."""
    if info is not None:
        for attr in ("num_cores", "num_tensorcores", "cores_per_chip",
                     "tensorcores_per_chip", "core_count"):
            v = getattr(info, attr, None)
            try:
                v = int(v)
            except (TypeError, ValueError):
                continue
            if 0 < v <= 16:
                return v
    return 1


def _scoped_vmem_limit(info):
    """Explicit scoped-VMEM limit: half of physical (>= 32 MiB), with headroom."""
    phys = None
    if info is not None:
        v = getattr(info, "vmem_capacity_bytes", None)
        try:
            v = int(v)
        except (TypeError, ValueError):
            v = None
        if v and v > 0:
            phys = v
    if phys is None:
        phys = 64 << 20                       # conservative: v7x per-TC VMEM
    return int(min(max(32 << 20, phys // 2), phys - (8 << 20)))


def _pick_hw_tile(hw, c, itemsize, target_bytes):
    """Whole image per block if it fits; otherwise the largest divisor of HW
    that is a multiple of 128 lanes and fits the per-row budget."""
    if c * hw * itemsize <= target_bytes:
        return hw
    best = None
    for d in range(1, math.isqrt(hw) + 1):
        if hw % d:
            continue
        for cand in (d, hw // d):
            if cand % 128 == 0 and c * cand * itemsize <= target_bytes:
                if best is None or cand > best:
                    best = cand
    # No clean 128-multiple divisor: fall back to the whole (unpadded) image.
    return best if best is not None else hw


def _pick_nb(n, per_row_bytes, target_bytes, num_cores):
    cap = max(1, min(n, target_bytes // max(per_row_bytes, 1)))
    if num_cores >= 2 and n >= num_cores:
        # Keep >= num_cores batch-grid steps so every TensorCore gets work.
        # Skipped on 1-TC parts (v5e/v6e) where it only doubles step overhead.
        cap = min(cap, max(1, -(-n // num_cores)))
    if cap >= n:
        return n
    if cap >= 8:
        return (cap // 8) * 8      # keep the (nb, C) output block sublane-aligned
    return cap


def channel_attention(x, w1, b1, w2, b2, *, target_block_bytes=None):
    """x: (N, C, H, W); w1: (Cr, C); b1: (Cr,); w2: (C, Cr); b2: (C,).
    Returns sigmoid channel-attention weights of shape (N, C, 1, 1)."""
    N, C, H, W = x.shape
    HW = H * W
    x2 = x.reshape(N, C, HW)                        # free reshape (NCHW contiguous)
    w1t = jnp.transpose(w1).astype(jnp.float32)     # (C, Cr)
    w2t = jnp.transpose(w2).astype(jnp.float32)     # (Cr, C)
    b1r = b1.reshape(1, -1).astype(jnp.float32)     # (1, Cr)
    b2r = b2.reshape(1, -1).astype(jnp.float32)     # (1, C)

    info = _tpu_info()
    num_cores = _num_tensorcores(info)
    vmem_limit = _scoped_vmem_limit(info)
    if target_block_bytes is None:
        # ~8 MiB x-blocks (2 pipeline buffers + temps comfortably under limit).
        target_block_bytes = int(min(8 << 20, vmem_limit // 6))

    itemsize = x.dtype.itemsize
    hw_tile = _pick_hw_tile(HW, C, itemsize, target_block_bytes)
    nb = _pick_nb(N, C * hw_tile * itemsize, target_block_bytes, num_cores)
    grid = (pl.cdiv(N, nb), HW // hw_tile)

    kernel = functools.partial(channel_attention_kernel, hw_total=float(HW))

    out2 = pl.pallas_call(
        kernel,
        out_shape=jax.ShapeDtypeStruct((N, C), x.dtype),
        grid=grid,
        in_specs=[
            pl.BlockSpec((nb, C, hw_tile), lambda n, k: (n, 0, k)),  # x chunk
            pl.BlockSpec(w1t.shape, lambda n, k: (0, 0)),            # tiny weights
            pl.BlockSpec(b1r.shape, lambda n, k: (0, 0)),
            pl.BlockSpec(w2t.shape, lambda n, k: (0, 0)),
            pl.BlockSpec(b2r.shape, lambda n, k: (0, 0)),
        ],
        out_specs=pl.BlockSpec((nb, C), lambda n, k: (n, 0)),
        scratch_shapes=[
            pltpu.VMEM((nb, C), jnp.float32),   # running max
            pltpu.VMEM((nb, C), jnp.float32),   # running sum
        ],
        compiler_params=pltpu.CompilerParams(
            dimension_semantics=("parallel", "arbitrary"),
            vmem_limit_bytes=int(vmem_limit)),
    )(x2, w1t, b1r, w2t, b2r)
    return out2.reshape(N, C, 1, 1)


def reference(x, w1, b1, w2, b2):
    """Pure-JAX reference matching the PyTorch ChannelAttentionModule forward."""
    mx = jnp.max(x, axis=(2, 3))                    # (N, C)
    av = jnp.mean(x, axis=(2, 3))                   # (N, C)

    def mlp(v):
        h = jnp.maximum(v @ w1.T + b1, 0.0)
        return h @ w2.T + b2

    y = mlp(mx) + mlp(av)
    return jax.nn.sigmoid(y).reshape(x.shape[0], x.shape[1], 1, 1)


if __name__ == "__main__":
    key = jax.random.PRNGKey(0)
    kx, k1, k2, k3, k4 = jax.random.split(key, 5)

    N, C, H, W = 2, 32, 16, 16
    reduction_ratio = 4
    Cr = C // reduction_ratio

    x = jax.random.normal(kx, (N, C, H, W), dtype=jnp.float32)
    # Deterministic synthetic shared-MLP parameters (Linear C->Cr, Linear Cr->C).
    w1 = 0.1 * jax.random.normal(k1, (Cr, C), dtype=jnp.float32)
    b1 = 0.1 * jax.random.normal(k2, (Cr,), dtype=jnp.float32)
    w2 = 0.1 * jax.random.normal(k3, (C, Cr), dtype=jnp.float32)
    b2 = 0.1 * jax.random.normal(k4, (C,), dtype=jnp.float32)

    ref = jax.block_until_ready(reference(x, w1, b1, w2, b2))

    # Default path: whole H*W per block (single reduction step per image batch).
    out = jax.block_until_ready(channel_attention(x, w1, b1, w2, b2))
    assert out.shape == (N, C, 1, 1)
    assert jnp.allclose(out, ref, rtol=1e-5, atol=1e-5), "mismatch (default path)"

    # Force the H*W-split accumulator path (used when one image is larger than
    # the VMEM block budget, e.g. v7x robustness) and verify it as well.
    out_split = jax.block_until_ready(
        channel_attention(x, w1, b1, w2, b2,
                          target_block_bytes=C * 128 * x.dtype.itemsize))
    assert jnp.allclose(out_split, ref, rtol=1e-5, atol=1e-5), "mismatch (split path)"

    print("KERNEL_OK")
</pallas_src>

<mosaic_0001>
module attributes {stable_mosaic.version = 11 : i64} {
  func.func @channel_attention_kernel(%arg0: i32, %arg1: i32, %arg2: memref<2x32x256xf32, #tpu.memory_space<vmem>>, %arg3: memref<32x8xf32, #tpu.memory_space<vmem>>, %arg4: memref<1x8xf32, #tpu.memory_space<vmem>>, %arg5: memref<8x32xf32, #tpu.memory_space<vmem>>, %arg6: memref<1x32xf32, #tpu.memory_space<vmem>>, %arg7: memref<2x32xf32, #tpu.memory_space<vmem>>, %arg8: memref<2x32xf32, #tpu.memory_space<vmem>>, %arg9: memref<2x32xf32, #tpu.memory_space<vmem>>) attributes {dimension_semantics = [#tpu.dimension_semantics<parallel>, #tpu.dimension_semantics<arbitrary>], iteration_bounds = array<i64: 1, 1>, scalar_prefetch = 0 : i64, scratch_operands = 2 : i64, tpu.core_type = #tpu.core_type<tc>, window_params = [{transform_indices = @transform_0, window_bounds = array<i64: 2, 32, 256>}, {pipeline_mode = #tpu.pipeline_mode<synchronous>, transform_indices = @transform_1, window_bounds = array<i64: 32, 8>}, {pipeline_mode = #tpu.pipeline_mode<synchronous>, transform_indices = @transform_2, window_bounds = array<i64: 1, 8>}, {pipeline_mode = #tpu.pipeline_mode<synchronous>, transform_indices = @transform_3, window_bounds = array<i64: 8, 32>}, {pipeline_mode = #tpu.pipeline_mode<synchronous>, transform_indices = @transform_4, window_bounds = array<i64: 1, 32>}, {transform_indices = @transform_5, window_bounds = array<i64: 2, 32>}]} {
    %c0_i32 = arith.constant 0 : i32
    %0 = arith.cmpi eq, %arg1, %c0_i32 : i32
    %1 = arith.extui %0 : i1 to i32
    %c0_i32_0 = arith.constant 0 : i32
    %2 = arith.cmpi ne, %1, %c0_i32_0 : i32
    scf.if %2 {
      %cst_14 = arith.constant 0xFF800000 : f32
      %15 = vector.broadcast %cst_14 : f32 to vector<2x32xf32>
      %c0_15 = arith.constant 0 : index
      %c0_16 = arith.constant 0 : index
      %16 = vector.load %arg8[%c0_15, %c0_16] : memref<2x32xf32, #tpu.memory_space<vmem>>, vector<2x32xf32>
      tpu.vector_store %arg8[%c0_15, %c0_16], %15 {strides = array<i32>} : memref<2x32xf32, #tpu.memory_space<vmem>>, vector<2x32xf32>,
      %cst_17 = arith.constant 0.000000e+00 : f32
      %17 = vector.broadcast %cst_17 : f32 to vector<2x32xf32>
      %c0_18 = arith.constant 0 : index
      %c0_19 = arith.constant 0 : index
      %18 = vector.load %arg9[%c0_18, %c0_19] : memref<2x32xf32, #tpu.memory_space<vmem>>, vector<2x32xf32>
      tpu.vector_store %arg9[%c0_18, %c0_19], %17 {strides = array<i32>} : memref<2x32xf32, #tpu.memory_space<vmem>>, vector<2x32xf32>,
    } else {
    }
    %c0 = arith.constant 0 : index
    %c0_1 = arith.constant 0 : index
    %c0_2 = arith.constant 0 : index
    %3 = vector.load %arg2[%c0, %c0_1, %c0_2] : memref<2x32x256xf32, #tpu.memory_space<vmem>>, vector<2x32x256xf32>
    %c0_3 = arith.constant 0 : index
    %c0_4 = arith.constant 0 : index
    %4 = vector.load %arg8[%c0_3, %c0_4] : memref<2x32xf32, #tpu.memory_space<vmem>>, vector<2x32xf32>
    %cst = arith.constant dense<0xFF800000> : vector<2x32xf32>
    %5 = vector.multi_reduction <maximumf>, %3, %cst [2] : vector<2x32x256xf32> to vector<2x32xf32>
    %6 = arith.maximumf %4, %5 : vector<2x32xf32>
    %c0_5 = arith.constant 0 : index
    %c0_6 = arith.constant 0 : index
    %7 = vector.load %arg8[%c0_5, %c0_6] : memref<2x32xf32, #tpu.memory_space<vmem>>, vector<2x32xf32>
    tpu.vector_store %arg8[%c0_5, %c0_6], %6 {strides = array<i32>} : memref<2x32xf32, #tpu.memory_space<vmem>>, vector<2x32xf32>,
    %c0_7 = arith.constant 0 : index
    %c0_8 = arith.constant 0 : index
    %8 = vector.load %arg9[%c0_7, %c0_8] : memref<2x32xf32, #tpu.memory_space<vmem>>, vector<2x32xf32>
    %cst_9 = arith.constant dense<0.000000e+00> : vector<2x32xf32>
    %9 = vector.multi_reduction <add>, %3, %cst_9 [2] : vector<2x32x256xf32> to vector<2x32xf32>
    %10 = arith.addf %8, %9 : vector<2x32xf32>
    %c0_10 = arith.constant 0 : index
    %c0_11 = arith.constant 0 : index
    %11 = vector.load %arg9[%c0_10, %c0_11] : memref<2x32xf32, #tpu.memory_space<vmem>>, vector<2x32xf32>
    tpu.vector_store %arg9[%c0_10, %c0_11], %10 {strides = array<i32>} : memref<2x32xf32, #tpu.memory_space<vmem>>, vector<2x32xf32>,
    %c0_i32_12 = arith.constant 0 : i32
    %12 = arith.cmpi eq, %arg1, %c0_i32_12 : i32
    %13 = arith.extui %12 : i1 to i32
    %c0_i32_13 = arith.constant 0 : i32
    %14 = arith.cmpi ne, %13, %c0_i32_13 : i32
    scf.if %14 {
      %c0_14 = arith.constant 0 : index
      %c0_15 = arith.constant 0 : index
      %15 = vector.load %arg8[%c0_14, %c0_15] : memref<2x32xf32, #tpu.memory_space<vmem>>, vector<2x32xf32>
      %c0_16 = arith.constant 0 : index
      %c0_17 = arith.constant 0 : index
      %16 = vector.load %arg9[%c0_16, %c0_17] : memref<2x32xf32, #tpu.memory_space<vmem>>, vector<2x32xf32>
      %cst_18 = arith.constant 3.906250e-03 : f32
      %17 = vector.broadcast %cst_18 : f32 to vector<2x32xf32>
      %18 = arith.mulf %16, %17 : vector<2x32xf32>
      %19 = tpu.concatenate %15, %18 in 0 : vector<2x32xf32>, vector<2x32xf32> -> vector<4x32xf32>
      %c0_19 = arith.constant 0 : index
      %c0_20 = arith.constant 0 : index
      %20 = vector.load %arg3[%c0_19, %c0_20] : memref<32x8xf32, #tpu.memory_space<vmem>>, vector<32x8xf32>
      %cst_21 = arith.constant dense<0.000000e+00> : vector<4x8xf32>
      %21 = tpu.matmul %19, %20, %cst_21 {dimension_numbers = #tpu.dot_dimension_numbers<[1], [0], [0], [1], [0, 0, 1, 1], [], []>} : vector<4x32xf32>, vector<32x8xf32>, vector<4x8xf32> -> vector<4x8xf32>
      %c0_22 = arith.constant 0 : index
      %c0_23 = arith.constant 0 : index
      %22 = vector.load %arg4[%c0_22, %c0_23] : memref<1x8xf32, #tpu.memory_space<vmem>>, vector<1x8xf32>
      %23 = vector.broadcast %22 : vector<1x8xf32> to vector<4x8xf32>
      %24 = arith.addf %21, %23 : vector<4x8xf32>
      %cst_24 = arith.constant 0.000000e+00 : f32
      %25 = vector.broadcast %cst_24 : f32 to vector<4x8xf32>
      %26 = arith.maximumf %24, %25 : vector<4x8xf32>
      %c0_25 = arith.constant 0 : index
      %c0_26 = arith.constant 0 : index
      %27 = vector.load %arg5[%c0_25, %c0_26] : memref<8x32xf32, #tpu.memory_space<vmem>>, vector<8x32xf32>
      %cst_27 = arith.constant dense<0.000000e+00> : vector<4x32xf32>
      %28 = tpu.matmul %26, %27, %cst_27 {dimension_numbers = #tpu.dot_dimension_numbers<[1], [0], [0], [1], [0, 0, 1, 1], [], []>} : vector<4x8xf32>, vector<8x32xf32>, vector<4x32xf32> -> vector<4x32xf32>
      %c0_28 = arith.constant 0 : index
      %c0_29 = arith.constant 0 : index
      %29 = vector.load %arg6[%c0_28, %c0_29] : memref<1x32xf32, #tpu.memory_space<vmem>>, vector<1x32xf32>
      %30 = vector.broadcast %29 : vector<1x32xf32> to vector<4x32xf32>
      %31 = arith.addf %28, %30 : vector<4x32xf32>
      %32 = vector.extract_strided_slice %31 {offsets = [0, 0], sizes = [2, 32], strides = [1, 1]} : vector<4x32xf32> to vector<2x32xf32>
      %33 = vector.extract_strided_slice %31 {offsets = [2, 0], sizes = [2, 32], strides = [1, 1]} : vector<4x32xf32> to vector<2x32xf32>
      %34 = arith.addf %32, %33 : vector<2x32xf32>
      %cst_30 = arith.constant 0.000000e+00 : f32
      %35 = vector.broadcast %cst_30 : f32 to vector<2x32xf32>
      %36 = arith.subf %35, %34 : vector<2x32xf32>
      %37 = math.exp %36 : vector<2x32xf32>
      %cst_31 = arith.constant 1.000000e+00 : f32
      %38 = vector.broadcast %cst_31 : f32 to vector<2x32xf32>
      %39 = arith.addf %38, %37 : vector<2x32xf32>
      %cst_32 = arith.constant 1.000000e+00 : f32
      %40 = vector.broadcast %cst_32 : f32 to vector<2x32xf32>
      %41 = arith.divf %40, %39 : vector<2x32xf32>
      %c0_33 = arith.constant 0 : index
      %c0_34 = arith.constant 0 : index
      %42 = vector.load %arg7[%c0_33, %c0_34] : memref<2x32xf32, #tpu.memory_space<vmem>>, vector<2x32xf32>
      tpu.vector_store %arg7[%c0_33, %c0_34], %41 {strides = array<i32>} : memref<2x32xf32, #tpu.memory_space<vmem>>, vector<2x32xf32>,
    } else {
    }
    return
  }
  func.func @transform_0(%arg0: i32, %arg1: i32) -> (i32, i32, i32) {
    %c0_i32 = arith.constant 0 : i32
    %c0_i32_0 = arith.constant 0 : i32
    return %arg0, %c0_i32, %arg1 : i32, i32, i32
  }
  func.func @transform_1(%arg0: i32, %arg1: i32) -> (i32, i32) {
    %c0_i32 = arith.constant 0 : i32
    %c0_i32_0 = arith.constant 0 : i32
    %c0_i32_1 = arith.constant 0 : i32
    return %c0_i32, %c0_i32_0 : i32, i32
  }
  func.func @transform_2(%arg0: i32, %arg1: i32) -> (i32, i32) {
    %c0_i32 = arith.constant 0 : i32
    %c0_i32_0 = arith.constant 0 : i32
    %c0_i32_1 = arith.constant 0 : i32
    return %c0_i32, %c0_i32_0 : i32, i32
  }
  func.func @transform_3(%arg0: i32, %arg1: i32) -> (i32, i32) {
    %c0_i32 = arith.constant 0 : i32
    %c0_i32_0 = arith.constant 0 : i32
    %c0_i32_1 = arith.constant 0 : i32
    return %c0_i32, %c0_i32_0 : i32, i32
  }
  func.func @transform_4(%arg0: i32, %arg1: i32) -> (i32, i32) {
    %c0_i32 = arith.constant 0 : i32
    %c0_i32_0 = arith.constant 0 : i32
    %c0_i32_1 = arith.constant 0 : i32
    return %c0_i32, %c0_i32_0 : i32, i32
  }
  func.func @transform_5(%arg0: i32, %arg1: i32) -> (i32, i32) {
    %c0_i32 = arith.constant 0 : i32
    %c0_i32_0 = arith.constant 0 : i32
    return %arg0, %c0_i32 : i32, i32
  }
}

</mosaic_0001>

<bundles_post_ra>
// kernel: tpu_custom_call.1
= control target key start
LH: loop header
LB: loop body
LE: loop exit
PB: predicated region body
PF: predicated region fallthrough
CT: control target
= control target key end

     0   :  { %10 = vsyncpa [#allocation5], 0  ;;  %s618_s0 = inlined_call_operand.hbm [shape: f32[2,32,256], index: 0, kind: input, shape index: {}]   ;;  %s619_s1 = inlined_call_operand.vmem [shape: f32[32,8], index: 1, kind: input, shape index: {}]   ;;  %s620_s2 = inlined_call_operand.vmem [shape: f32[1,8], index: 2, kind: input, shape index: {}]   ;;  %s621_s3 = inlined_call_operand.vmem [shape: f32[8,32], index: 3, kind: input, shape index: {}]   ;;  %s622_s4 = inlined_call_operand.vmem [shape: f32[1,32], index: 4, kind: input, shape index: {}]   ;;  %s623_s5 = inlined_call_operand.hbm [shape: f32[2,32], index: 5, kind: output, shape index: {}]  }
   0x1   :  { %11 = vsyncpa [#allocation6], 0  ;;  %s516_s18 = smov [#allocation4]   ;;  %s468_s22 = scalar_lea.hbm %s618_s0, 2048 }
   0x2   :  { %s17_s19 = sshll.u32 %s516_s18, 4  ;;  %p469_p0 = scmp.ne.s32.totalorder %s618_s0, %s468_s22  ;;  %s18_s19 = int_to_ptr.vmem [resolvable:$true] %s17_s19 }
   0x3   :  { %p472_p1 = scmp.lt.u32.totalorder %s468_s22, %s618_s0 }
   0x5   :  { %p474_p2 = pnand %p472_p1, %p469_p0 }
   0x7   :  { %477 = shalt.err (!%p474_p2)
}
   0x8   :  { %s478_s27 = scalar_lea.vmem %s18_s19, 2048  ;;  %p483_p4 = scmp.lt.s32.totalorder %s18_s19, %s18_s19 }
   0x9   :  { %p479_p3 = scmp.ne.s32.totalorder %s18_s19, %s478_s27  ;;  %p484_p5 = scmp.lt.s32.totalorder %s478_s27, %s478_s27 }
   0xb   :  { %p485_p6 = por %p484_p5, %p483_p4 }
   0xd   :  { %p486_p7 = pnand %p485_p6, %p479_p3 }
   0xf   :  { %489 = shalt.err (!%p486_p7)
}
  0x10   :  { %s517_s28 = smov 256   ;;  %s518_s29 = smov 16  }
  0x11   :  { %23 = dma.hbm_to_vmem [thread:$0]  %s618_s0, 2048, %s18_s19, [#allocation5], %s517_s28, %s517_s28, %s518_s29  }
  0x12   :  { %512 = dma.done.wait [#allocation5], 2048  }
  0x13   :  { %513 = vsyncadd [#allocation5], 4294965248  ;;  %v50_v0 = vld [vmem:[#allocation4 + $0x40] sm:$0xff]  ;;  %v51_v1 = vld [vmem:[#allocation4 + $0x48] sm:$0xff]  ;;  %vm39_vm0 = vcmask 254976   ;;  %v519_v30 = vmov 0.0   ;;  %v91_v41 = vlaneseq }
  0x14   :  { %v42_v2 = vld [vmem:[#allocation4] sm:$0xff]  ;;  %v156_v3 = vadd.f32 %v51_v1, %v50_v0  ;;  %v43_v4 = vld [vmem:[#allocation4 + $0x8] sm:$0xff]  ;;  %v52_v5 = vld [vmem:[#allocation4 + $0x50] sm:$0xff]  ;;  %v71_v27 = vmax.f32 %v50_v0, %v51_v1  ;;  %41 = vst.msk [vmem:[#allocation3] sm:$0x3] %vm39_vm0, %v519_v30  ;;  %445 = vmatprep.subr.mxu1 %v519_v30  ;;  %v520_v33 = vmov -inf  }
  0x15   :  { %v53_v6 = vld [vmem:[#allocation4 + $0x58] sm:$0xff]  ;;  %v144_v7 = vadd.f32 %v43_v4, %v42_v2  ;;  %v44_v8 = vld [vmem:[#allocation4 + $0x10] sm:$0xff]  ;;  %v54_v12 = vld [vmem:[#allocation4 + $0x60] sm:$0xff]  ;;  %v59_v25 = vmax.f32 %v42_v2, %v43_v4  ;;  %40 = vst.msk [vmem:[#allocation2] sm:$0x3] %vm39_vm0, %v520_v33  ;;  %v521_v39 = vmov 0.0|0.0  }
  0x16   :  { %v45_v9 = vld [vmem:[#allocation4 + $0x18] sm:$0xff]  ;;  %157 = vadd.xlane.f32.xlu1 %v156_v3  ;;  %v159_v10 = vadd.f32 %v53_v6, %v52_v5  ;;  %v55_v13 = vld [vmem:[#allocation4 + $0x68] sm:$0xff]  ;;  %v46_v14 = vld [vmem:[#allocation4 + $0x20] sm:$0xff]  ;;  %v74_v26 = vmax.f32 %v52_v5, %v53_v6  ;;  %450 = vmatprep.subr.bf16.mxu0 %v521_v39  ;;  %vm522_vm1 = vmmov 0   ;;  %v92_v42 = vand.u32 127, %v91_v41 }
  0x17   :  { %145 = vadd.xlane.f32.xlu0 %v144_v7  ;;  %v147_v11 = vadd.f32 %v45_v9, %v44_v8  ;;  %v47_v15 = vld [vmem:[#allocation4 + $0x28] sm:$0xff]  ;;  %v162_v16 = vadd.f32 %v55_v13, %v54_v12  ;;  %v56_v18 = vld [vmem:[#allocation4 + $0x70] sm:$0xff]  ;;  %v57_v19 = vld [vmem:[#allocation4 + $0x78] sm:$0xff]  ;;  %v62_v24 = vmax.f32 %v44_v8, %v45_v9  ;;  %v77_v28 = vmax.f32 %v54_v12, %v55_v13 }
  0x18   :  { %v150_v17 = vadd.f32 %v47_v15, %v46_v14  ;;  %v48_v20 = vld [vmem:[#allocation4 + $0x30] sm:$0xff]  ;;  %v49_v21 = vld [vmem:[#allocation4 + $0x38] sm:$0xff]  ;;  %v165_v22 = vadd.f32 %v57_v19, %v56_v18  ;;  %v65_v29 = vmax.f32 %v46_v14, %v47_v15  ;;  %v80_v31 = vmax.f32 %v56_v18, %v57_v19  ;;  %v230_v35 = vld [vmem:[%s619_s1 + $0x8] sm:$0xff]  ;;  %442 = vmatprep.mubr.msk.f32.mxu0 %vm522_vm1, %v519_v30 }
  0x19   :  { %v153_v23 = vadd.f32 %v49_v21, %v48_v20  ;;  %v68_v32 = vmax.f32 %v48_v20, %v49_v21  ;;  %v229_v34 = vld [vmem:[%s619_s1] sm:$0xff]  ;;  %v231_v37 = vld [vmem:[%s619_s1 + $0x10] sm:$0xff]  ;;  %v232_v38 = vld [vmem:[%s619_s1 + $0x18] sm:$0xff]  ;;  %447 = vmatprep.mubr.msk.f32.mxu1 %vm522_vm1, %v519_v30  ;;  %v97_v45 = vadd.s32 4294967288, %v92_v42  ;;  %v104_v46 = vadd.s32 4294967280, %v92_v42 }
  0x1a   :  { %160 = vadd.xlane.f32.xlu1 %v159_v10  ;;  %v451_v36 = vpack.c.bf16 %v230_v35, %v229_v34  ;;  %v454_v40 = vpack.c.bf16 %v232_v38, %v231_v37  ;;  %v94_v47 = vshrl.u32 %v91_v41, 7  ;;  %v111_v51 = vadd.s32 4294967272, %v92_v42 }
  0x1b   :  { %148 = vadd.xlane.f32.xlu0 %v147_v11  ;;  %vm102_vm2 = vcmask 130112   ;;  %vm109_vm3 = vcmask 195712   ;;  %vm116_vm4 = vcmask 261312   ;;  %vm137_vm5 = vcmask 1041409   ;;  %v143_v8 = vld [vmem:[#allocation3] sm:$0x3] }
  0x1c   :  { %452 = vmatpush3.bf16.msra.mxu0 %v451_v36  ;;  %v100_v49 = vsub.s32 %v97_v45, %v94_v47  ;;  %v107_v52 = vsub.s32 %v104_v46, %v94_v47  ;;  %v95_v53 = vsub.s32 %v92_v42, %v94_v47  ;;  %v114_v57 = vsub.s32 %v111_v51, %v94_v47  ;;  %v58_v33 = vld [vmem:[#allocation2] sm:$0x3] }
  0x1d   :  { %453 = vmatprep.subr.bf16.mxu0 %v521_v39  ;;  %vm227_vm6 = vcmask 1041408   ;;  %vm240_vm7 = vcmask 261120   ;;  %v315_v42 = vld [vmem:[%s621_s3] sm:$0xff]  ;;  %vm323_vm8 = vcmask 64512  }
  0x1e   :  { %163 = vadd.xlane.f32.xlu1 %v162_v16  ;;  %446 = vmatpush3.msra.mxu1 %v315_v42 }
  0x1f   :  { %151 = vadd.xlane.f32.xlu0 %v150_v17 }
  0x20   :  { %455 = vmatpush3.bf16.msra.mxu0 %v454_v40 }
  0x22   :  { %166 = vadd.xlane.f32.xlu1 %v165_v22 }
  0x23   :  { %154 = vadd.xlane.f32.xlu0 %v153_v23 }
  0x26   :  { %63 = vmax.xlane.f32.xlu1 %v62_v24 }
  0x27   :  { %60 = vmax.xlane.f32.xlu0 %v59_v25 }
  0x2a   :  { %75 = vmax.xlane.f32.xlu1 %v74_v26 }
  0x2b   :  { %72 = vmax.xlane.f32.xlu0 %v71_v27 }
  0x2e   :  { %78 = vmax.xlane.f32.xlu1 %v77_v28 }
  0x2f   :  { %66 = vmax.xlane.f32.xlu0 %v65_v29 }
  0x32   :  { %81 = vmax.xlane.f32.xlu1 %v80_v31 }
  0x33   :  { %69 = vmax.xlane.f32.xlu0 %v68_v32 }
  0xa3   :  { %v158_v43 = vpop.xlane.xlu1 %157 }
  0xa4   :  { %v146_v44 = vpop.xlane.xlu0 %145  ;;  %v198_v60 = vrot.slane %v158_v43, %v95_v53  ;;  %v423_v43 = vld [vmem:[%s620_s2] ss:$0 sm:$0xff]  ;;  %s523_s2 = smov [#allocation7]  }
  0xa5   :  { %v179_v62 = vrot.slane %v146_v44, %v95_v53  ;;  %s414_s3 = sshll.u32 %s523_s2, 4  ;;  %s415_s3 = int_to_ptr.vmem [resolvable:$true] %s414_s3 }
  0xa6   :  { %s490_s19 = scalar_lea.vmem %s415_s3, 32  ;;  %p495_p9 = scmp.lt.s32.totalorder %s415_s3, %s415_s3 }
  0xa7   :  { %v161_v48 = vpop.xlane.xlu1 %160  ;;  %p491_p8 = scmp.ne.s32.totalorder %s415_s3, %s490_s19  ;;  %p496_p10 = scmp.lt.s32.totalorder %s490_s19, %s490_s19 }
  0xa8   :  { %v149_v50 = vpop.xlane.xlu0 %148  ;;  %v202_v55 = vrot.slane %v161_v48, %v100_v49  ;;  %v425_v48 = vld [vmem:[%s622_s4] ss:$0 sm:$0xff] }
  0xa9   :  { %v183_v58 = vrot.slane %v149_v50, %v100_v49  ;;  %p497_p11 = por %p496_p10, %p495_p9 }
  0xaa   :  { %v203_v0 = vsel %vm102_vm2, %v202_v55, %v198_v60 }
  0xab   :  { %v164_v54 = vpop.xlane.xlu1 %163  ;;  %v184_v3 = vsel %vm102_vm2, %v183_v58, %v179_v62  ;;  %p498_p12 = pnand %p497_p11, %p491_p8 }
  0xac   :  { %v152_v56 = vpop.xlane.xlu0 %151  ;;  %v207_v59 = vrot.slane %v164_v54, %v107_v52 }
  0xad   :  { %v188_v61 = vrot.slane %v152_v56, %v107_v52 }
  0xae   :  { %v208_v4 = vsel %vm109_vm3, %v207_v59, %v203_v0 }
  0xaf   :  { %v167_v63 = vpop.xlane.xlu1 %166  ;;  %v189_v6 = vsel %vm109_vm3, %v188_v61, %v184_v3 }
  0xb0   :  { %v212_v1 = vrot.slane %v167_v63, %v114_v57  ;;  %v155_v2 = vpop.xlane.xlu0 %154 }
  0xb1   :  { %v193_v5 = vrot.slane %v155_v2, %v114_v57 }
  0xb2   :  { %v213_v7 = vsel %vm116_vm4, %v212_v1, %v208_v4 }
  0xb3   :  { %v194_v9 = vsel %vm116_vm4, %v193_v5, %v189_v6  ;;  %v64_v10 = vpop.xlane.xlu1 %63 }
  0xb4   :  { %v214_v11 = vsel %vm137_vm5, %v213_v7, %v194_v9  ;;  %v61_v12 = vpop.xlane.xlu0 %60  ;;  %v101_v20 = vrot.slane %v64_v10, %v100_v49 }
  0xb5   :  { %v216_v13 = vadd.f32 %v214_v11, %v143_v8  ;;  %v96_v21 = vrot.slane %v61_v12, %v95_v53 }
  0xb7   :  { %v76_v14 = vpop.xlane.xlu1 %75  ;;  %217 = vst.msk [vmem:[#allocation3] sm:$0x3] %vm39_vm0, %v216_v13  ;;  %v103_v28 = vsel %vm102_vm2, %v101_v20, %v96_v21 }
  0xb8   :  { %v73_v15 = vpop.xlane.xlu0 %72  ;;  %v125_v17 = vrot.slane %v76_v14, %v100_v49 }
  0xb9   :  { %v121_v18 = vrot.slane %v73_v15, %v95_v53 }
  0xbb   :  { %v79_v16 = vpop.xlane.xlu1 %78  ;;  %v126_v25 = vsel %vm102_vm2, %v125_v17, %v121_v18 }
  0xbc   :  { %v67_v19 = vpop.xlane.xlu0 %66  ;;  %v130_v22 = vrot.slane %v79_v16, %v107_v52 }
  0xbd   :  { %v108_v23 = vrot.slane %v67_v19, %v107_v52 }
  0xbe   :  { %v131_v29 = vsel %vm109_vm3, %v130_v22, %v126_v25  ;;  %v222_v37 = vld [vmem:[#allocation3] sm:$0x3] }
  0xbf   :  { %v82_v24 = vpop.xlane.xlu1 %81  ;;  %v110_v31 = vsel %vm109_vm3, %v108_v23, %v103_v28  ;;  %v223_v38 = vmul.f32 0.00390625, %v222_v37 }
  0xc0   :  { %v135_v26 = vrot.slane %v82_v24, %v114_v57  ;;  %v70_v27 = vpop.xlane.xlu0 %69 }
  0xc1   :  { %v115_v30 = vrot.slane %v70_v27, %v114_v57  ;;  %v225_v39 = vrot.slane %v223_v38, 6 }
  0xc2   :  { %v136_v32 = vsel %vm116_vm4, %v135_v26, %v131_v29 }
  0xc3   :  { %v117_v34 = vsel %vm116_vm4, %v115_v30, %v110_v31 }
  0xc4   :  { %v138_v35 = vsel %vm137_vm5, %v136_v32, %v117_v34 }
  0xc5   :  { %v140_v36 = vmax.f32 %v58_v33, %v138_v35 }
  0xc7   :  { %142 = vst.msk [vmem:[#allocation2] sm:$0x3] %vm39_vm0, %v140_v36 }
  0xce   :  { %v221_v40 = vld [vmem:[#allocation2] sm:$0x3] }
  0xcf   :  { %v228_v41 = vsel %vm227_vm6, %v221_v40, %v225_v39 }
  0xd0   :  { %443 = vmatmul.mubr.msk.f32.vlgmr.msra.gmra.mrb[0].mxu0 %vm240_vm7, %v228_v41 }
 0x1a3   :  { %v310_v44 = vpop.f32.mrb[0].mxu0 }
 0x1a4   :  { %v311_v45 = vadd.f32 %v423_v43, %v310_v44  ;;  %v444_v46 = vpop.f32.mrb[1].mxu0 }
 0x1a6   :  { %v314_v47 = vmax.f32 %v311_v45, 0.0 }
 0x1a8   :  { %448 = vmatmul.mubr.msk.f32.vlgmr.msra.gmra.mrb[0].mxu1 %vm323_vm8, %v314_v47 }
 0x27b   :  { %v393_v49 = vpop.f32.mrb[0].mxu1 }
 0x27c   :  { %v394_v50 = vadd.f32 %v425_v48, %v393_v49  ;;  %v449_v51 = vpop.f32.mrb[1].mxu1 }
 0x27e   :  { %v398_v52 = vrot.slane %v394_v50, 2 }
 0x280   :  { %v400_v53 = vadd.f32 %v398_v52, %v394_v50 }
 0x282   :  { %v401_v54 = vsub.f32 0.0, %v400_v53 }
 0x284   :  { %v402_v55 = vmul.f32 1.442695, %v401_v54 }
 0x286   :  { %464 = vpow2.f32 %v402_v55 }
 0x290   :  { %v465_v56 = vpop.eup %464 }
 0x291   :  { %v404_v57 = vadd.f32 1.0, %v465_v56 }
 0x293   :  { %466 = vrcp.f32 %v404_v57 }
 0x29d   :  { %v467_v58 = vpop.eup %466 }
 0x29e   :  { %407 = vst.msk [vmem:[#allocation7] sm:$0x3] %vm39_vm0, %v467_v58 }
 0x29f   :  { %501 = shalt.err (!%p498_p12)
}
 0x2a0   :  { %s502_s21 = scalar_lea.hbm %s623_s5, 32 }
 0x2a1   :  { %p503_p13 = scmp.ne.s32.totalorder %s623_s5, %s502_s21  ;;  %p506_p0 = scmp.lt.u32.totalorder %s502_s21, %s623_s5 }
 0x2a3   :  { %p508_p1 = pnand %p506_p0, %p503_p13 }
 0x2a5   :  { %511 = shalt.err (!%p508_p1)
}
 0x2a6   :  { %417 = dma.vmem_to_hbm [thread:$0]  %s415_s3, 32, %s623_s5, [#allocation6]  }
 0x2a7   :  { %514 = dma.done.wait [#allocation6], 32  }
 0x2a8   :  { %515 = vsyncadd [#allocation6], 4294967264 }
 0x2a9   :  { %421 = vsyncpa [#allocation5], 1 }
 0x2aa   :  { %422 = vsyncpa [#allocation6], 1 }

</bundles_post_ra>
